<compile_context>
chip_gen: v5e
topology: v5e:2x2
jax: 0.10.0
libtpu: 0.0.40
codegen_flags: <defaults>
</compile_context>

<pallas_src>
import functools

import jax
import jax.numpy as jnp
from jax.experimental import pallas as pl
from jax.experimental.pallas import tpu as pltpu


def _conv3x3_relu_kernel(x_ref, w_ref, b_ref, o_ref, *, H, lanes_out):
    # x_ref : (H+2, (W+2)*Cin)        lane-packed, zero-padded rows of 1 image
    # w_ref : ((W+2)*Cin, 3*W*Cout)   3 banded kh planes concatenated along N
    # b_ref : (1, W*Cout)             bias broadcast over W (f32)
    # o_ref : (H, W*Cout)             lane-packed output rows
    x = x_ref[...]
    # Single wide matmul: M=H+2, K=(W+2)*Cin, N=3*W*Cout.  The three kh
    # partials live in adjacent 128-lane (vreg-aligned) column slices.
    p = jnp.dot(x, w_ref[...], preferred_element_type=jnp.float32)
    # kh shift applied on the unpacked f32 result (cheap sublane shift);
    # lane slices at multiples of 128 are free (vreg boundaries).
    acc = (p[0:H, 0:lanes_out]
           + p[1:H + 1, lanes_out:2 * lanes_out]
           + p[2:H + 2, 2 * lanes_out:3 * lanes_out])
    acc = acc + b_ref[...]                                     # bias (f32)
    o_ref[...] = jnp.maximum(acc, 0.0).astype(o_ref.dtype)     # ReLU + cast


def _build_banded_weight(weight, W, dtype):
    """Expand PyTorch (Cout, Cin, 3, 3) weights into one wide banded RHS.

    wide[(w + kw)*Cin + ci, kh*W*Cout + w*Cout + co] == weight[co, ci, kh, kw]
    so a single matmul of the lane-packed padded rows against `wide` yields,
    per kh, the horizontal part of the SAME 3x3 conv; the vertical (kh) sum
    is applied in the kernel via sublane shifts of the result.
    Fully vectorized: no per-output-column update loop.
    """
    Cout, Cin = weight.shape[0], weight.shape[1]
    w_hwio = jnp.transpose(weight, (2, 3, 1, 0)).astype(dtype)   # (3,3,Cin,Cout)
    r = jnp.arange(W + 2)                      # padded-row block index
    w = jnp.arange(W)                          # output-column block index
    kw = r[None, :] - w[:, None]               # (W, W+2) relative tap
    valid = (kw >= 0) & (kw < 3)
    kw_c = jnp.clip(kw, 0, 2)
    gathered = w_hwio[:, kw_c]                 # (3, W, W+2, Cin, Cout)
    planes = jnp.where(valid[None, :, :, None, None], gathered,
                       jnp.zeros((), dtype))
    # (kh, w, r, ci, co) -> (kh, r, ci, w, co) -> (3, (W+2)*Cin, W*Cout)
    planes = jnp.transpose(planes, (0, 2, 3, 1, 4)).reshape(
        3, (W + 2) * Cin, W * Cout)
    # Concatenate the 3 kh planes along the output-lane axis: (lanes_in, 3*lanes_out)
    return jnp.transpose(planes, (1, 0, 2)).reshape(
        (W + 2) * Cin, 3 * W * Cout)


def precompute_conv_params(weight, bias, W, compute_dtype=jnp.bfloat16):
    """One-time weight/bias expansion; cache and reuse across calls."""
    Cout = weight.shape[0]
    banded_wide = _build_banded_weight(weight, W, compute_dtype)
    bias_row = jnp.tile(bias.astype(jnp.float32), W).reshape(1, W * Cout)
    return banded_wide, bias_row


def vgg16_cnn_block(x_nchw, weight, bias, *, compute_dtype=jnp.bfloat16,
                    out_dtype=None, params=None):
    """Conv2d(kernel_size=3, padding=1) + ReLU.

    x_nchw : (N, Cin, H, W) float32      (PyTorch NCHW)
    weight : (Cout, Cin, 3, 3)           (PyTorch OIHW)
    bias   : (Cout,)
    returns: (N, Cout, H, W) out_dtype (defaults to x dtype)
    """
    N, Cin, H, W = x_nchw.shape
    Cout = weight.shape[0]
    if out_dtype is None:
        out_dtype = x_nchw.dtype
    if params is None:
        params = precompute_conv_params(weight, bias, W, compute_dtype)
    banded_wide, bias_row = params

    lanes_in = (W + 2) * Cin
    lanes_out = W * Cout

    # NCHW -> NHWC, zero-pad spatial dims by 1 (padding=1 of nn.Conv2d), then
    # lane-pack rows: (N, H+2, (W+2)*Cin).  No halo gather: the whole padded
    # image is one grid block, so rows are never duplicated in HBM.
    x_nhwc = jnp.transpose(x_nchw, (0, 2, 3, 1))
    x_pad = jnp.pad(x_nhwc, ((0, 0), (1, 1), (1, 1), (0, 0)))
    x_rows = x_pad.reshape(N, H + 2, lanes_in).astype(compute_dtype)

    kernel = functools.partial(_conv3x3_relu_kernel, H=H, lanes_out=lanes_out)

    itm_in = jnp.dtype(compute_dtype).itemsize
    cost = pl.CostEstimate(
        flops=2 * N * H * W * Cout * 9 * Cin,
        transcendentals=0,
        bytes_accessed=(N * (H + 2) * lanes_in * itm_in
                        + lanes_in * 3 * lanes_out * itm_in
                        + 4 * lanes_out
                        + N * H * lanes_out * jnp.dtype(out_dtype).itemsize))

    out_rows = pl.pallas_call(
        kernel,
        out_shape=jax.ShapeDtypeStruct((N, H, lanes_out), out_dtype),
        grid_spec=pltpu.PrefetchScalarGridSpec(
            num_scalar_prefetch=0,
            grid=(N,),                         # one step per image; 2 parallel
            in_specs=[                         # steps -> one per v7x TC
                pl.BlockSpec((None, H + 2, lanes_in), lambda n: (n, 0, 0)),
                pl.BlockSpec((lanes_in, 3 * lanes_out), lambda n: (0, 0)),
                pl.BlockSpec((1, lanes_out), lambda n: (0, 0)),
            ],
            out_specs=pl.BlockSpec((None, H, lanes_out), lambda n: (n, 0, 0)),
        ),
        compiler_params=pltpu.CompilerParams(
            dimension_semantics=("parallel",)),
        cost_estimate=cost,
    )(x_rows, banded_wide, bias_row)

    # (N, H, W*Cout) -> NHWC -> NCHW (PyTorch output convention).
    out_nhwc = out_rows.reshape(N, H, W, Cout)
    return jnp.transpose(out_nhwc, (0, 3, 1, 2))


def _ref_conv_relu(x, weight, bias, precision=None):
    out = jax.lax.conv_general_dilated(
        x, weight, window_strides=(1, 1), padding="SAME",
        dimension_numbers=("NCHW", "OIHW", "NCHW"), precision=precision)
    out = out + bias.reshape(1, -1, 1, 1)
    return jnp.maximum(out, 0.0)


if __name__ == "__main__":
    # Small shapes consistent with the module: batch=2, in_channels=4,
    # out_channels=8, spatial=16.
    N, Cin, Cout, H, W = 2, 4, 8, 16, 16

    key = jax.random.PRNGKey(0)
    kx, kw, kb = jax.random.split(key, 3)
    x = jax.random.normal(kx, (N, Cin, H, W), dtype=jnp.float32)
    weight = jax.random.normal(kw, (Cout, Cin, 3, 3), dtype=jnp.float32) * 0.1
    bias = jax.random.normal(kb, (Cout,), dtype=jnp.float32) * 0.1

    # Weight expansion precomputed ONCE and reused (perf review: hoist/cache).
    params_bf16 = jax.tree_util.tree_map(
        jax.block_until_ready, precompute_conv_params(weight, bias, W, jnp.bfloat16))
    params_f32 = jax.tree_util.tree_map(
        jax.block_until_ready, precompute_conv_params(weight, bias, W, jnp.float32))

    fwd_bf16 = jax.jit(lambda xx: vgg16_cnn_block(
        xx, weight, bias, compute_dtype=jnp.bfloat16, params=params_bf16))
    fwd_f32 = jax.jit(lambda xx: vgg16_cnn_block(
        xx, weight, bias, compute_dtype=jnp.float32, params=params_f32))

    # Default bf16 compute path: compare against a reference whose inputs are
    # rounded to bf16 the same way (accumulation stays f32).
    out_bf16 = jax.block_until_ready(fwd_bf16(x))
    ref_bf16 = _ref_conv_relu(
        x.astype(jnp.bfloat16).astype(jnp.float32),
        weight.astype(jnp.bfloat16).astype(jnp.float32),
        bias, precision=jax.lax.Precision.HIGHEST)
    assert out_bf16.shape == (N, Cout, H, W)
    assert out_bf16.dtype == jnp.float32
    assert jnp.allclose(out_bf16, ref_bf16, atol=1e-2, rtol=1e-2)

    # f32 compute path: exact nn.Conv2d(3x3, padding=1) + ReLU semantics.
    out_f32 = jax.block_until_ready(fwd_f32(x))
    ref_f32 = _ref_conv_relu(x, weight, bias,
                             precision=jax.lax.Precision.HIGHEST)
    assert jnp.allclose(out_f32, ref_f32, atol=1e-3, rtol=1e-3)

    print("KERNEL_OK")
</pallas_src>

<mosaic_0001>
module attributes {stable_mosaic.version = 11 : i64} {
  func.func @_conv3x3_relu_kernel(%arg0: i32, %arg1: memref<1x18x72xbf16, #tpu.memory_space<vmem>>, %arg2: memref<72x384xbf16, #tpu.memory_space<vmem>>, %arg3: memref<1x128xf32, #tpu.memory_space<vmem>>, %arg4: memref<1x16x128xf32, #tpu.memory_space<vmem>>) attributes {dimension_semantics = [#tpu.dimension_semantics<parallel>], iteration_bounds = array<i64: 2>, scalar_prefetch = 0 : i64, scratch_operands = 0 : i64, tpu.core_type = #tpu.core_type<tc>, window_params = [{transform_indices = @transform_0, window_bounds = array<i64: 1, 18, 72>}, {pipeline_mode = #tpu.pipeline_mode<synchronous>, transform_indices = @transform_1, window_bounds = array<i64: 72, 384>}, {pipeline_mode = #tpu.pipeline_mode<synchronous>, transform_indices = @transform_2, window_bounds = array<i64: 1, 128>}, {transform_indices = @transform_3, window_bounds = array<i64: 1, 16, 128>}]} {
    %c0 = arith.constant 0 : index
    %c0_0 = arith.constant 0 : index
    %c0_1 = arith.constant 0 : index
    %0 = vector.load %arg1[%c0, %c0_0, %c0_1] : memref<1x18x72xbf16, #tpu.memory_space<vmem>>, vector<1x18x72xbf16>
    %1 = vector.shape_cast %0 : vector<1x18x72xbf16> to vector<18x72xbf16>
    %c0_2 = arith.constant 0 : index
    %c0_3 = arith.constant 0 : index
    %2 = vector.load %arg2[%c0_2, %c0_3] : memref<72x384xbf16, #tpu.memory_space<vmem>>, vector<72x384xbf16>
    %cst = arith.constant dense<0.000000e+00> : vector<18x384xf32>
    %3 = tpu.matmul %1, %2, %cst {dimension_numbers = #tpu.dot_dimension_numbers<[1], [0], [0], [1], [0, 0, 1, 1], [], []>} : vector<18x72xbf16>, vector<72x384xbf16>, vector<18x384xf32> -> vector<18x384xf32>
    %4 = vector.extract_strided_slice %3 {offsets = [0, 0], sizes = [16, 128], strides = [1, 1]} : vector<18x384xf32> to vector<16x128xf32>
    %5 = vector.extract_strided_slice %3 {offsets = [1, 128], sizes = [16, 128], strides = [1, 1]} : vector<18x384xf32> to vector<16x128xf32>
    %6 = arith.addf %4, %5 : vector<16x128xf32>
    %7 = vector.extract_strided_slice %3 {offsets = [2, 256], sizes = [16, 128], strides = [1, 1]} : vector<18x384xf32> to vector<16x128xf32>
    %8 = arith.addf %6, %7 : vector<16x128xf32>
    %c0_4 = arith.constant 0 : index
    %c0_5 = arith.constant 0 : index
    %9 = vector.load %arg3[%c0_4, %c0_5] : memref<1x128xf32, #tpu.memory_space<vmem>>, vector<1x128xf32>
    %10 = vector.broadcast %9 : vector<1x128xf32> to vector<16x128xf32>
    %11 = arith.addf %8, %10 : vector<16x128xf32>
    %cst_6 = arith.constant 0.000000e+00 : f32
    %12 = vector.broadcast %cst_6 : f32 to vector<16x128xf32>
    %13 = arith.maximumf %11, %12 : vector<16x128xf32>
    %c0_7 = arith.constant 0 : index
    %c0_8 = arith.constant 0 : index
    %c0_9 = arith.constant 0 : index
    %14 = vector.load %arg4[%c0_7, %c0_8, %c0_9] : memref<1x16x128xf32, #tpu.memory_space<vmem>>, vector<1x16x128xf32>
    %15 = vector.shape_cast %14 : vector<1x16x128xf32> to vector<16x128xf32>
    %16 = vector.shape_cast %13 : vector<16x128xf32> to vector<1x16x128xf32>
    tpu.vector_store %arg4[%c0_7, %c0_8, %c0_9], %16 {strides = array<i32>} : memref<1x16x128xf32, #tpu.memory_space<vmem>>, vector<1x16x128xf32>,
    return
  }
  func.func @transform_0(%arg0: i32) -> (i32, i32, i32) {
    %c0_i32 = arith.constant 0 : i32
    %c0_i32_0 = arith.constant 0 : i32
    %c0_i32_1 = arith.constant 0 : i32
    return %arg0, %c0_i32, %c0_i32_0 : i32, i32, i32
  }
  func.func @transform_1(%arg0: i32) -> (i32, i32) {
    %c0_i32 = arith.constant 0 : i32
    %c0_i32_0 = arith.constant 0 : i32
    %c0_i32_1 = arith.constant 0 : i32
    return %c0_i32, %c0_i32_0 : i32, i32
  }
  func.func @transform_2(%arg0: i32) -> (i32, i32) {
    %c0_i32 = arith.constant 0 : i32
    %c0_i32_0 = arith.constant 0 : i32
    %c0_i32_1 = arith.constant 0 : i32
    return %c0_i32, %c0_i32_0 : i32, i32
  }
  func.func @transform_3(%arg0: i32) -> (i32, i32, i32) {
    %c0_i32 = arith.constant 0 : i32
    %c0_i32_0 = arith.constant 0 : i32
    %c0_i32_1 = arith.constant 0 : i32
    return %arg0, %c0_i32, %c0_i32_0 : i32, i32, i32
  }
}

</mosaic_0001>

<bundles_post_ra>
// kernel: _lambda_.1
= control target key start
LH: loop header
LB: loop body
LE: loop exit
PB: predicated region body
PF: predicated region fallthrough
CT: control target
= control target key end

     0   :  { %s559_s12 = smov 0   ;;  %s675_s0 = inlined_call_operand.vmem [shape: bf16[2,18,72], index: 0, kind: input, shape index: {}]   ;;  %s676_s1 = inlined_call_operand.vmem [shape: bf16[72,384], index: 1, kind: input, shape index: {}]   ;;  %s677_s2 = inlined_call_operand.vmem [shape: f32[1,128], index: 2, kind: input, shape index: {}]   ;;  %s678_s3 = inlined_call_operand.vmem [shape: f32[2,16,128], index: 3, kind: output, shape index: {}]  }
   0x1 LB: > { %s434_s13 = sadd.s32 4294967295, %s537_s12   ;;  %p438_p0 = scmp.ge.s32.totalorder %s537_s12, 1  ;;  %s537_s12 = sphi %s559_s12, %s13_s12  }
   0x2   : > { %p137_p1 = scmp.lt.s32.totalorder %s537_s12, 3 }
   0x4   : > { %p138_p2 = pnand %p438_p0, %p137_p1 }
   0x5   : > { %p593_p3 = scmp.lt.s32.totalorder (!%p138_p2), %s434_s13, 1 }
   0x6   : > { %141 = sbr.rel (%p138_p2) target bundleno = 194 (0xc2), region = 32 }
   0xb   : > { %v191_v0 = vld [vmem:[%s676_s1 + $0x60] sm:$0xff]  ;;  %v192_v1 = vld [vmem:[%s676_s1 + $0x68] sm:$0xf]  ;;  %vm280_vm0 = vcmask 1043456   ;;  %v513_v5 = vld [vmem:[%s676_s1 + $0x4c] sm:$0xf] }
   0xc   : > { %v244_v2 = vunpack.c.h.b16 %v191_v0  ;;  %v245_v3 = vunpack.c.l.b16 %v192_v1  ;;  %v243_v4 = vunpack.c.l.b16 %v191_v0  ;;  %v486_v8 = vld [vmem:[%s676_s1 + $0x54] sm:$0xf0]  ;;  %v492_v9 = vld [vmem:[%s676_s1 + $0x50] sm:$0xf]  ;;  %v515_v10 = vld [vmem:[%s676_s1 + $0x58] sm:$0xf0] }
   0xd   : > { %v484_v12 = vld [vmem:[%s676_s1 + $0x48] sm:$0xf]  ;;  %v514_v13 = vld [vmem:[%s676_s1 + $0x50] sm:$0xf0]  ;;  %v489_v17 = vor.u32 %v513_v5, %v486_v8  ;;  %v493_v18 = vor.u32 %v515_v10, %v492_v9  ;;  %v474_v20 = vld [vmem:[%s676_s1 + $0x3c] sm:$0xf0] }
   0xe   : > { %v259_v6 = vpack.c.b16 %v244_v2, %v244_v2  ;;  %v260_v7 = vpack.c.b16 %v245_v3, %v245_v3  ;;  %v258_v11 = vpack.c.b16 %v243_v4, %v243_v4  ;;  %v510_v19 = vld [vmem:[%s676_s1 + $0x34] sm:$0xf]  ;;  %v480_v21 = vld [vmem:[%s676_s1 + $0x38] sm:$0xf]  ;;  %v512_v22 = vld [vmem:[%s676_s1 + $0x40] sm:$0xf0]  ;;  %v485_v23 = vor.u32 %v514_v13, %v484_v12 }
   0xf   : > { %v472_v24 = vld [vmem:[%s676_s1 + $0x30] sm:$0xf]  ;;  %v511_v25 = vld [vmem:[%s676_s1 + $0x38] sm:$0xf0]  ;;  %s681_s13 = smov (!%p593_p3, %s434_s13), 1  ;;  %v477_v26 = vor.u32 %v510_v19, %v474_v20  ;;  %v481_v27 = vor.u32 %v512_v22, %v480_v21  ;;  %vm273_vm1 = vcmask 588800  }
  0x10   : > { %v285_v14 = vsel %vm280_vm0, %v259_v6, 0  ;;  %v288_v15 = vsel %vm280_vm0, %v260_v7, 0  ;;  %v282_v16 = vsel %vm280_vm0, %v258_v11, 0  ;;  %v507_v28 = vld [vmem:[%s676_s1 + $0x1c] sm:$0xf]  ;;  %s521_s20 = smul.u32 12, %s681_s13  ;;  %v473_v32 = vor.u32 %v511_v25, %v472_v24 }
  0x11   : > { %310 = vmatpush.bf16.msra.mxu1 %v285_v14  ;;  %328 = vmatpush.bf16.msra.mxu2 %v288_v15  ;;  %v462_v29 = vld [vmem:[%s676_s1 + $0x24] sm:$0xf0]  ;;  %v468_v30 = vld [vmem:[%s676_s1 + $0x20] sm:$0xf]  ;;  %v509_v31 = vld [vmem:[%s676_s1 + $0x28] sm:$0xf0] }
  0x12   : > { %293 = vmatpush.bf16.msra.mxu0 %v282_v16  ;;  %516 = vmatpush.bf16.msra.mxu3 %v282_v16  ;;  %v460_v33 = vld [vmem:[%s676_s1 + $0x18] sm:$0xf]  ;;  %v508_v34 = vld [vmem:[%s676_s1 + $0x20] sm:$0xf0]  ;;  %v465_v35 = vor.u32 %v507_v28, %v462_v29  ;;  %v469_v36 = vor.u32 %v509_v31, %v468_v30  ;;  %v450_v38 = vld [vmem:[%s676_s1 + $0xc] sm:$0xf0]  ;;  %s165_s10 = scalar_lea.vmem %s675_s0, %s521_s20 }
  0x13   : > { %v504_v37 = vld [vmem:[%s676_s1 + $0x4] sm:$0xf]  ;;  %v456_v39 = vld [vmem:[%s676_s1 + $0x8] sm:$0xf]  ;;  %v506_v40 = vld [vmem:[%s676_s1 + $0x10] sm:$0xf0]  ;;  %v461_v41 = vor.u32 %v508_v34, %v460_v33 }
  0x14   : > { %v174_v42 = vld [vmem:[%s165_s10 + $0x8] sm:$0x1]  ;;  %v448_v43 = vld [vmem:[%s676_s1] sm:$0xf]  ;;  %v505_v44 = vld [vmem:[%s676_s1 + $0x8] sm:$0xf0]  ;;  %v453_v45 = vor.u32 %v504_v37, %v450_v38  ;;  %v457_v46 = vor.u32 %v506_v40, %v456_v39 }
  0x15   : > { %311 = vmatpush.bf16.msra.mxu1 %v489_v17  ;;  %329 = vmatpush.bf16.msra.mxu2 %v493_v18  ;;  %v198_v47 = vunpack.c.l.b16 %v174_v42  ;;  %v449_v48 = vor.u32 %v505_v44, %v448_v43  ;;  %v503_v49 = vld [vmem:[%s165_s10] sm:$0xff]  ;;  %vm346_vm2 = vcmask 1046528   ;;  %vm359_vm3 = vcmask 1045504   ;;  %s502_s23 = sshll.u32 %s681_s13, 4 }
  0x16   : > { %294 = vmatpush.bf16.msra.mxu0 %v485_v23  ;;  %517 = vmatpush.bf16.msra.mxu3 %v485_v23  ;;  %v530_v0 = vld [vmem:[%s677_s2] ss:$0 sm:$0xff]  ;;  %s170_s26 = scalar_lea.vmem %s678_s3, %s502_s23 }
  0x17   : > { %v200_v50 = vpack.c.b16 %v198_v47, %v198_v47 }
  0x19   : > { %312 = vmatpush.bf16.msra.mxu1 %v477_v26  ;;  %330 = vmatpush.bf16.msra.mxu2 %v481_v27 }
  0x1a   : > { %295 = vmatpush.bf16.msra.mxu0 %v473_v32  ;;  %518 = vmatpush.bf16.msra.mxu3 %v473_v32 }
  0x1d   : > { %313 = vmatpush.bf16.msra.mxu1 %v465_v35  ;;  %331 = vmatpush.bf16.msra.mxu2 %v469_v36 }
  0x1e   : > { %296 = vmatpush.bf16.msra.mxu0 %v461_v41  ;;  %519 = vmatpush.bf16.msra.mxu3 %v461_v41 }
  0x21   : > { %314 = vmatpush.bf16.msra.mxu1 %v453_v45  ;;  %332 = vmatpush.bf16.msra.mxu2 %v457_v46 }
  0x22   : > { %297 = vmatpush.bf16.msra.mxu0 %v449_v48  ;;  %520 = vmatpush.bf16.msra.mxu3 %v449_v48 }
  0x24   : > { %496 = vmatmul.msk.bf16.vlgmr.msra.gmra.mxu1 %vm273_vm1, %v503_v49  ;;  %498 = vmatmul.msk.bf16.vlgmr.msra.gmra.mxu2 %vm273_vm1, %v503_v49 }
  0x25   : > { %494 = vmatmul.msk.bf16.vlgmr.msra.gmra.mxu0 %vm273_vm1, %v503_v49  ;;  %495 = vmatmul.msk.bf16.vlgmr.msra.gmra.mxu3 %vm273_vm1, %v200_v50 }
  0x34   : > { %497 = vmatmul.msk.bf16.gmra.mxu1 %vm273_vm1, %v200_v50  ;;  %499 = vmatmul.msk.bf16.gmra.mxu2 %vm273_vm1, %v200_v50 }
  0xa1   : > { %v316_v51 = vpop.f32.mrf.mxu1 }
  0xa2   : > { %v347_v56 = vrot.slane %v316_v51, 1  ;;  %v299_v57 = vpop.f32.mrf.mxu0 }
  0xa7   : > { %v334_v52 = vpop.f32.mrf.mxu2 }
  0xa8   : > { %v304_v53 = vpop.f32.mrf.mxu3  ;;  %v360_v60 = vrot.slane %v334_v52, 2 }
  0xa9   : > { %v318_v54 = vpop.f32.mrf.mxu1 }
  0xaa   : > { %v348_v55 = vrot.slane %v318_v54, 1  ;;  %v301_v9 = vpop.f32.mrf.mxu0 }
  0xac   : > { %v349_v58 = vsel %vm346_vm2, %v347_v56, %v348_v55 }
  0xad   : > { %v354_v63 = vadd.f32 %v349_v58, %v299_v57 }
  0xaf   : > { %v336_v59 = vpop.f32.mrf.mxu2 }
  0xb0   : > { %v361_v61 = vrot.slane %v336_v59, 2  ;;  %v305_v62 = vpop.f32.mrf.mxu3 }
  0xb1   : > { %v321_v1 = vpop.f32.mrf.mxu1 }
  0xb2   : > { %v362_v2 = vsel %vm359_vm3, %v360_v60, %v361_v61  ;;  %v350_v3 = vrot.slane %v321_v1, 1 }
  0xb3   : > { %v367_v4 = vadd.f32 %v362_v2, %v354_v63 }
  0xb4   : > { %v351_v6 = vsel %vm346_vm2, %v348_v55, %v350_v3 }
  0xb5   : > { %v373_v5 = vadd.f32 %v530_v0, %v367_v4  ;;  %v355_v11 = vadd.f32 %v351_v6, %v301_v9 }
  0xb7   : > { %v375_v7 = vmax.f32 %v373_v5, 0.0  ;;  %v339_v8 = vpop.f32.mrf.mxu2 }
  0xb8   : > { %v363_v10 = vrot.slane %v339_v8, 2 }
  0xb9   : > { %377 = vst [vmem:[%s170_s26] sm:$0xff] %v375_v7  ;;  %v323_v12 = vpop.f32.mrf.mxu1 }
  0xba   : > { %v364_v13 = vsel %vm359_vm3, %v361_v61, %v363_v10 }
  0xbb   : > { %v368_v14 = vadd.f32 %v364_v13, %v355_v11 }
  0xbd   : > { %v374_v15 = vadd.f32 %v530_v0, %v368_v14 }
  0xbf   : > { %v376_v16 = vmax.f32 %v374_v15, 0.0  ;;  %v341_v17 = vpop.f32.mrf.mxu2 }
  0xc1   : > { %378 = vst [vmem:[%s170_s26 + $0x8] sm:$0xff] %v376_v16 }
  0xc2 PF: > { %s13_s12 = sadd.s32 1, %s537_s12  }
  0xc3   : > { %p10_p4 = scmp.ge.s32.totalorder %s13_s12, 4  }
  0xc5   :  { %12 = sbr.rel (!%p10_p4) target bundleno = 1 (0x1), region = 62 }

</bundles_post_ra>
